<compile_context>
chip_gen: v6e
topology: v6e:2x2x1
jax: 0.10.0
libtpu: 0.0.40
codegen_flags: <defaults>
</compile_context>

<pallas_src>
import functools

import jax
import jax.numpy as jnp
from jax.experimental import pallas as pl
from jax.experimental.pallas import tpu as pltpu


def _round_up(x, m):
    return ((x + m - 1) // m) * m


@functools.lru_cache(maxsize=None)
def _vmem_limit_bytes():
    """Request (physical VMEM - 16 MiB) so big tiles fit on v5e/v6e (128 MiB)
    while leaving compiler scratch headroom on v7x (64 MiB)."""
    try:
        cap = int(pltpu.get_tpu_info().vmem_capacity_bytes)
    except Exception:
        cap = 64 * 1024 * 1024
    return max(cap - 16 * 1024 * 1024, 32 * 1024 * 1024)


def _choose_batch_tile(batch, tb_max):
    """Tile size that (a) caps at tb_max, (b) minimizes padding, and
    (c) gives >= 2 grid steps for large batches (v7x megacore)."""
    min_tiles = 2 if batch >= 4096 else 1
    n_tiles = max(pl.cdiv(batch, tb_max), min_tiles)
    tb = _round_up(pl.cdiv(batch, n_tiles), 8)
    return tb


# ----------------------------------------------------------------------------
# Kernel
# ----------------------------------------------------------------------------
def koopman_kernel(x_ref, u_ref,
                   w1t_ref, b1_ref, w2t_ref, b2_ref,
                   kt_ref, bt_ref,
                   w3t_ref, b3_ref, w4t_ref, b4_ref,
                   out_ref):
    # Streamed batch tile (already bf16 in HBM).
    x = x_ref[...]
    u = u_ref[...]

    # encoder: Linear(state_dim,128) -> ReLU -> Linear(128, latent_dim)
    h1 = jnp.dot(x, w1t_ref[...], preferred_element_type=jnp.float32) + b1_ref[...]
    h1 = jnp.maximum(h1, 0.0)
    z = jnp.dot(h1.astype(jnp.bfloat16), w2t_ref[...],
                preferred_element_type=jnp.float32) + b2_ref[...]

    # Koopman dynamics: z_next = z @ K.T + u @ B.T  (two accumulated MXU dots,
    # no odd-width concat).
    z_next = (jnp.dot(z.astype(jnp.bfloat16), kt_ref[...],
                      preferred_element_type=jnp.float32)
              + jnp.dot(u, bt_ref[...], preferred_element_type=jnp.float32))

    # decoder: Linear(latent_dim,128) -> ReLU -> Linear(128, state_dim)
    h2 = jnp.dot(z_next.astype(jnp.bfloat16), w3t_ref[...],
                 preferred_element_type=jnp.float32) + b3_ref[...]
    h2 = jnp.maximum(h2, 0.0)
    x_next = jnp.dot(h2.astype(jnp.bfloat16), w4t_ref[...],
                     preferred_element_type=jnp.float32) + b4_ref[...]

    # One packed, single-stream output slab: [x_next | z | z_next].
    out_ref[...] = jnp.concatenate([x_next, z, z_next], axis=-1).astype(out_ref.dtype)


# ----------------------------------------------------------------------------
# One-time parameter preparation (hoisted out of the per-call wrapper)
# ----------------------------------------------------------------------------
def prepare_params(params):
    """Transpose PyTorch-layout weights and cast to bf16 (biases stay f32)."""
    bf = jnp.bfloat16
    f32 = jnp.float32
    return dict(
        w1t=params["w1"].T.astype(bf),             # (state_dim, 128)
        b1=params["b1"][None, :].astype(f32),      # (1, 128)
        w2t=params["w2"].T.astype(bf),             # (128, latent)
        b2=params["b2"][None, :].astype(f32),      # (1, latent)
        kt=params["K"].T.astype(bf),               # (latent, latent)
        bt=params["B"].T.astype(bf),               # (action, latent)
        w3t=params["w3"].T.astype(bf),             # (latent, 128)
        b3=params["b3"][None, :].astype(f32),      # (1, 128)
        w4t=params["w4"].T.astype(bf),             # (128, state_dim)
        b4=params["b4"][None, :].astype(f32),      # (1, state_dim)
    )


# ----------------------------------------------------------------------------
# Wrapper
# ----------------------------------------------------------------------------
@functools.partial(jax.jit, static_argnames=("block_batch",))
def koopman_encoder_forward(x, u, pp, *, block_batch=8192):
    """x: (B, state_dim), u: (B, action_dim), pp = prepare_params(params).

    Returns (x_next_pred, z, z_next_pred) as bf16 (f32 accumulation inside;
    bf16 HBM stores halve output traffic of this memory-bound kernel).
    """
    B, state_dim = x.shape
    action_dim = u.shape[1]
    latent_dim = pp["w2t"].shape[1]
    out_w = state_dim + 2 * latent_dim

    # Cast streamed inputs once in the wrapper (halves input DMA).
    x = x.astype(jnp.bfloat16)
    u = u.astype(jnp.bfloat16)

    TB = _choose_batch_tile(B, block_batch)
    n_tiles = pl.cdiv(B, TB)
    Bp = n_tiles * TB
    if Bp != B:
        pad = Bp - B
        x = jnp.pad(x, ((0, pad), (0, 0)))
        u = jnp.pad(u, ((0, pad), (0, 0)))

    def batch_tile(feat):
        return pl.BlockSpec((TB, feat), lambda i: (i, 0))

    def resident(shape):
        return pl.BlockSpec(shape, lambda i: (0, 0))

    in_specs = [
        batch_tile(state_dim),            # x
        batch_tile(action_dim),           # u
        resident(pp["w1t"].shape),
        resident(pp["b1"].shape),
        resident(pp["w2t"].shape),
        resident(pp["b2"].shape),
        resident(pp["kt"].shape),
        resident(pp["bt"].shape),
        resident(pp["w3t"].shape),
        resident(pp["b3"].shape),
        resident(pp["w4t"].shape),
        resident(pp["b4"].shape),
    ]
    out_specs = batch_tile(out_w)         # packed [x_next | z | z_next]
    out_shape = jax.ShapeDtypeStruct((Bp, out_w), jnp.bfloat16)

    fn = pl.pallas_call(
        koopman_kernel,
        out_shape=out_shape,
        grid_spec=pltpu.PrefetchScalarGridSpec(
            num_scalar_prefetch=0,
            grid=(n_tiles,),
            in_specs=in_specs,
            out_specs=out_specs,
        ),
        compiler_params=pltpu.CompilerParams(
            dimension_semantics=("parallel",),
            vmem_limit_bytes=_vmem_limit_bytes(),
        ),
    )

    packed = fn(
        x, u,
        pp["w1t"], pp["b1"], pp["w2t"], pp["b2"],
        pp["kt"], pp["bt"],
        pp["w3t"], pp["b3"], pp["w4t"], pp["b4"],
    )

    x_next = packed[:B, :state_dim]
    z = packed[:B, state_dim:state_dim + latent_dim]
    z_next = packed[:B, state_dim + latent_dim:]
    return x_next, z, z_next


# ----------------------------------------------------------------------------
# Parameter init (PyTorch-layout) + reference
# ----------------------------------------------------------------------------
def init_params(key, state_dim, action_dim, latent_dim, hidden=128):
    ks = jax.random.split(key, 10)

    def lin(kw, kb, out_f, in_f):
        bound = 1.0 / jnp.sqrt(in_f)
        w = jax.random.uniform(kw, (out_f, in_f), jnp.float32, -bound, bound)
        b = jax.random.uniform(kb, (out_f,), jnp.float32, -bound, bound)
        return w, b

    w1, b1 = lin(ks[0], ks[1], hidden, state_dim)
    w2, b2 = lin(ks[2], ks[3], latent_dim, hidden)
    w3, b3 = lin(ks[4], ks[5], hidden, latent_dim)
    w4, b4 = lin(ks[6], ks[7], state_dim, hidden)
    K = jax.random.normal(ks[8], (latent_dim, latent_dim), jnp.float32)
    B = jax.random.normal(ks[9], (latent_dim, action_dim), jnp.float32)
    return dict(w1=w1, b1=b1, w2=w2, b2=b2, w3=w3, b3=b3, w4=w4, b4=b4, K=K, B=B)


def reference_forward(x, u, pp):
    """Pure-JAX reference mirroring the kernel's bf16-input / f32-accum math."""
    bf, f32 = jnp.bfloat16, jnp.float32
    h1 = jnp.maximum(
        jnp.dot(x.astype(bf), pp["w1t"], preferred_element_type=f32) + pp["b1"], 0.0)
    z = jnp.dot(h1.astype(bf), pp["w2t"], preferred_element_type=f32) + pp["b2"]
    z_next = (jnp.dot(z.astype(bf), pp["kt"], preferred_element_type=f32)
              + jnp.dot(u.astype(bf), pp["bt"], preferred_element_type=f32))
    h2 = jnp.maximum(
        jnp.dot(z_next.astype(bf), pp["w3t"], preferred_element_type=f32) + pp["b3"], 0.0)
    x_next = jnp.dot(h2.astype(bf), pp["w4t"], preferred_element_type=f32) + pp["b4"]
    return x_next, z, z_next


if __name__ == "__main__":
    batch, state_dim, action_dim, latent_dim = 8, 16, 8, 32

    key = jax.random.PRNGKey(0)
    kx, ku, kp = jax.random.split(key, 3)
    x = jax.random.normal(kx, (batch, state_dim), jnp.float32)
    u = jax.random.normal(ku, (batch, action_dim), jnp.float32)
    params = init_params(kp, state_dim, action_dim, latent_dim)
    pp = prepare_params(params)   # one-time: transposes, bf16 casts

    out = koopman_encoder_forward(x, u, pp)
    out = jax.block_until_ready(out)

    ref = reference_forward(x, u, pp)
    for got, want in zip(out, ref):
        assert got.shape == want.shape, f"shape mismatch {got.shape} vs {want.shape}"
        assert jnp.allclose(got.astype(jnp.float32), want, atol=2e-2, rtol=2e-2), \
            "mismatch vs reference"

    print("KERNEL_OK")
</pallas_src>

<mosaic_0001>
module attributes {stable_mosaic.version = 11 : i64} {
  func.func @koopman_kernel(%arg0: i32, %arg1: memref<8x16xbf16, #tpu.memory_space<vmem>>, %arg2: memref<8x8xbf16, #tpu.memory_space<vmem>>, %arg3: memref<16x128xbf16, #tpu.memory_space<vmem>>, %arg4: memref<1x128xf32, #tpu.memory_space<vmem>>, %arg5: memref<128x32xbf16, #tpu.memory_space<vmem>>, %arg6: memref<1x32xf32, #tpu.memory_space<vmem>>, %arg7: memref<32x32xbf16, #tpu.memory_space<vmem>>, %arg8: memref<8x32xbf16, #tpu.memory_space<vmem>>, %arg9: memref<32x128xbf16, #tpu.memory_space<vmem>>, %arg10: memref<1x128xf32, #tpu.memory_space<vmem>>, %arg11: memref<128x16xbf16, #tpu.memory_space<vmem>>, %arg12: memref<1x16xf32, #tpu.memory_space<vmem>>, %arg13: memref<8x80xbf16, #tpu.memory_space<vmem>>) attributes {dimension_semantics = [#tpu.dimension_semantics<parallel>], iteration_bounds = array<i64: 1>, scalar_prefetch = 0 : i64, scratch_operands = 0 : i64, tpu.core_type = #tpu.core_type<tc>, window_params = [{transform_indices = @transform_0, window_bounds = array<i64: 8, 16>}, {transform_indices = @transform_1, window_bounds = array<i64: 8, 8>}, {pipeline_mode = #tpu.pipeline_mode<synchronous>, transform_indices = @transform_2, window_bounds = array<i64: 16, 128>}, {pipeline_mode = #tpu.pipeline_mode<synchronous>, transform_indices = @transform_3, window_bounds = array<i64: 1, 128>}, {pipeline_mode = #tpu.pipeline_mode<synchronous>, transform_indices = @transform_4, window_bounds = array<i64: 128, 32>}, {pipeline_mode = #tpu.pipeline_mode<synchronous>, transform_indices = @transform_5, window_bounds = array<i64: 1, 32>}, {pipeline_mode = #tpu.pipeline_mode<synchronous>, transform_indices = @transform_6, window_bounds = array<i64: 32, 32>}, {pipeline_mode = #tpu.pipeline_mode<synchronous>, transform_indices = @transform_7, window_bounds = array<i64: 8, 32>}, {pipeline_mode = #tpu.pipeline_mode<synchronous>, transform_indices = @transform_8, window_bounds = array<i64: 32, 128>}, {pipeline_mode = #tpu.pipeline_mode<synchronous>, transform_indices = @transform_9, window_bounds = array<i64: 1, 128>}, {pipeline_mode = #tpu.pipeline_mode<synchronous>, transform_indices = @transform_10, window_bounds = array<i64: 128, 16>}, {pipeline_mode = #tpu.pipeline_mode<synchronous>, transform_indices = @transform_11, window_bounds = array<i64: 1, 16>}, {transform_indices = @transform_12, window_bounds = array<i64: 8, 80>}]} {
    %c0 = arith.constant 0 : index
    %c0_0 = arith.constant 0 : index
    %0 = vector.load %arg1[%c0, %c0_0] : memref<8x16xbf16, #tpu.memory_space<vmem>>, vector<8x16xbf16>
    %c0_1 = arith.constant 0 : index
    %c0_2 = arith.constant 0 : index
    %1 = vector.load %arg2[%c0_1, %c0_2] : memref<8x8xbf16, #tpu.memory_space<vmem>>, vector<8x8xbf16>
    %c0_3 = arith.constant 0 : index
    %c0_4 = arith.constant 0 : index
    %2 = vector.load %arg3[%c0_3, %c0_4] : memref<16x128xbf16, #tpu.memory_space<vmem>>, vector<16x128xbf16>
    %cst = arith.constant dense<0.000000e+00> : vector<8x128xf32>
    %3 = tpu.matmul %0, %2, %cst {dimension_numbers = #tpu.dot_dimension_numbers<[1], [0], [0], [1], [0, 0, 1, 1], [], []>} : vector<8x16xbf16>, vector<16x128xbf16>, vector<8x128xf32> -> vector<8x128xf32>
    %c0_5 = arith.constant 0 : index
    %c0_6 = arith.constant 0 : index
    %4 = vector.load %arg4[%c0_5, %c0_6] : memref<1x128xf32, #tpu.memory_space<vmem>>, vector<1x128xf32>
    %5 = vector.broadcast %4 : vector<1x128xf32> to vector<8x128xf32>
    %6 = arith.addf %3, %5 : vector<8x128xf32>
    %cst_7 = arith.constant 0.000000e+00 : f32
    %7 = vector.broadcast %cst_7 : f32 to vector<8x128xf32>
    %8 = arith.maximumf %6, %7 : vector<8x128xf32>
    %9 = arith.truncf %8 : vector<8x128xf32> to vector<8x128xbf16>
    %c0_8 = arith.constant 0 : index
    %c0_9 = arith.constant 0 : index
    %10 = vector.load %arg5[%c0_8, %c0_9] : memref<128x32xbf16, #tpu.memory_space<vmem>>, vector<128x32xbf16>
    %cst_10 = arith.constant dense<0.000000e+00> : vector<8x32xf32>
    %11 = tpu.matmul %9, %10, %cst_10 {dimension_numbers = #tpu.dot_dimension_numbers<[1], [0], [0], [1], [0, 0, 1, 1], [], []>} : vector<8x128xbf16>, vector<128x32xbf16>, vector<8x32xf32> -> vector<8x32xf32>
    %c0_11 = arith.constant 0 : index
    %c0_12 = arith.constant 0 : index
    %12 = vector.load %arg6[%c0_11, %c0_12] : memref<1x32xf32, #tpu.memory_space<vmem>>, vector<1x32xf32>
    %13 = vector.broadcast %12 : vector<1x32xf32> to vector<8x32xf32>
    %14 = arith.addf %11, %13 : vector<8x32xf32>
    %15 = arith.truncf %14 : vector<8x32xf32> to vector<8x32xbf16>
    %c0_13 = arith.constant 0 : index
    %c0_14 = arith.constant 0 : index
    %16 = vector.load %arg7[%c0_13, %c0_14] : memref<32x32xbf16, #tpu.memory_space<vmem>>, vector<32x32xbf16>
    %cst_15 = arith.constant dense<0.000000e+00> : vector<8x32xf32>
    %17 = tpu.matmul %15, %16, %cst_15 {dimension_numbers = #tpu.dot_dimension_numbers<[1], [0], [0], [1], [0, 0, 1, 1], [], []>} : vector<8x32xbf16>, vector<32x32xbf16>, vector<8x32xf32> -> vector<8x32xf32>
    %c0_16 = arith.constant 0 : index
    %c0_17 = arith.constant 0 : index
    %18 = vector.load %arg8[%c0_16, %c0_17] : memref<8x32xbf16, #tpu.memory_space<vmem>>, vector<8x32xbf16>
    %cst_18 = arith.constant dense<0.000000e+00> : vector<8x32xf32>
    %19 = tpu.matmul %1, %18, %cst_18 {dimension_numbers = #tpu.dot_dimension_numbers<[1], [0], [0], [1], [0, 0, 1, 1], [], []>} : vector<8x8xbf16>, vector<8x32xbf16>, vector<8x32xf32> -> vector<8x32xf32>
    %20 = arith.addf %17, %19 : vector<8x32xf32>
    %21 = arith.truncf %20 : vector<8x32xf32> to vector<8x32xbf16>
    %c0_19 = arith.constant 0 : index
    %c0_20 = arith.constant 0 : index
    %22 = vector.load %arg9[%c0_19, %c0_20] : memref<32x128xbf16, #tpu.memory_space<vmem>>, vector<32x128xbf16>
    %cst_21 = arith.constant dense<0.000000e+00> : vector<8x128xf32>
    %23 = tpu.matmul %21, %22, %cst_21 {dimension_numbers = #tpu.dot_dimension_numbers<[1], [0], [0], [1], [0, 0, 1, 1], [], []>} : vector<8x32xbf16>, vector<32x128xbf16>, vector<8x128xf32> -> vector<8x128xf32>
    %c0_22 = arith.constant 0 : index
    %c0_23 = arith.constant 0 : index
    %24 = vector.load %arg10[%c0_22, %c0_23] : memref<1x128xf32, #tpu.memory_space<vmem>>, vector<1x128xf32>
    %25 = vector.broadcast %24 : vector<1x128xf32> to vector<8x128xf32>
    %26 = arith.addf %23, %25 : vector<8x128xf32>
    %cst_24 = arith.constant 0.000000e+00 : f32
    %27 = vector.broadcast %cst_24 : f32 to vector<8x128xf32>
    %28 = arith.maximumf %26, %27 : vector<8x128xf32>
    %29 = arith.truncf %28 : vector<8x128xf32> to vector<8x128xbf16>
    %c0_25 = arith.constant 0 : index
    %c0_26 = arith.constant 0 : index
    %30 = vector.load %arg11[%c0_25, %c0_26] : memref<128x16xbf16, #tpu.memory_space<vmem>>, vector<128x16xbf16>
    %cst_27 = arith.constant dense<0.000000e+00> : vector<8x16xf32>
    %31 = tpu.matmul %29, %30, %cst_27 {dimension_numbers = #tpu.dot_dimension_numbers<[1], [0], [0], [1], [0, 0, 1, 1], [], []>} : vector<8x128xbf16>, vector<128x16xbf16>, vector<8x16xf32> -> vector<8x16xf32>
    %c0_28 = arith.constant 0 : index
    %c0_29 = arith.constant 0 : index
    %32 = vector.load %arg12[%c0_28, %c0_29] : memref<1x16xf32, #tpu.memory_space<vmem>>, vector<1x16xf32>
    %33 = vector.broadcast %32 : vector<1x16xf32> to vector<8x16xf32>
    %34 = arith.addf %31, %33 : vector<8x16xf32>
    %35 = tpu.concatenate %34, %14, %20 in 1 : vector<8x16xf32>, vector<8x32xf32>, vector<8x32xf32> -> vector<8x80xf32>
    %36 = arith.truncf %35 : vector<8x80xf32> to vector<8x80xbf16>
    %c0_30 = arith.constant 0 : index
    %c0_31 = arith.constant 0 : index
    %37 = vector.load %arg13[%c0_30, %c0_31] : memref<8x80xbf16, #tpu.memory_space<vmem>>, vector<8x80xbf16>
    tpu.vector_store %arg13[%c0_30, %c0_31], %36 {strides = array<i32>} : memref<8x80xbf16, #tpu.memory_space<vmem>>, vector<8x80xbf16>,
    return
  }
  func.func @transform_0(%arg0: i32) -> (i32, i32) {
    %c0_i32 = arith.constant 0 : i32
    %c0_i32_0 = arith.constant 0 : i32
    return %arg0, %c0_i32 : i32, i32
  }
  func.func @transform_1(%arg0: i32) -> (i32, i32) {
    %c0_i32 = arith.constant 0 : i32
    %c0_i32_0 = arith.constant 0 : i32
    return %arg0, %c0_i32 : i32, i32
  }
  func.func @transform_2(%arg0: i32) -> (i32, i32) {
    %c0_i32 = arith.constant 0 : i32
    %c0_i32_0 = arith.constant 0 : i32
    %c0_i32_1 = arith.constant 0 : i32
    return %c0_i32, %c0_i32_0 : i32, i32
  }
  func.func @transform_3(%arg0: i32) -> (i32, i32) {
    %c0_i32 = arith.constant 0 : i32
    %c0_i32_0 = arith.constant 0 : i32
    %c0_i32_1 = arith.constant 0 : i32
    return %c0_i32, %c0_i32_0 : i32, i32
  }
  func.func @transform_4(%arg0: i32) -> (i32, i32) {
    %c0_i32 = arith.constant 0 : i32
    %c0_i32_0 = arith.constant 0 : i32
    %c0_i32_1 = arith.constant 0 : i32
    return %c0_i32, %c0_i32_0 : i32, i32
  }
  func.func @transform_5(%arg0: i32) -> (i32, i32) {
    %c0_i32 = arith.constant 0 : i32
    %c0_i32_0 = arith.constant 0 : i32
    %c0_i32_1 = arith.constant 0 : i32
    return %c0_i32, %c0_i32_0 : i32, i32
  }
  func.func @transform_6(%arg0: i32) -> (i32, i32) {
    %c0_i32 = arith.constant 0 : i32
    %c0_i32_0 = arith.constant 0 : i32
    %c0_i32_1 = arith.constant 0 : i32
    return %c0_i32, %c0_i32_0 : i32, i32
  }
  func.func @transform_7(%arg0: i32) -> (i32, i32) {
    %c0_i32 = arith.constant 0 : i32
    %c0_i32_0 = arith.constant 0 : i32
    %c0_i32_1 = arith.constant 0 : i32
    return %c0_i32, %c0_i32_0 : i32, i32
  }
  func.func @transform_8(%arg0: i32) -> (i32, i32) {
    %c0_i32 = arith.constant 0 : i32
    %c0_i32_0 = arith.constant 0 : i32
    %c0_i32_1 = arith.constant 0 : i32
    return %c0_i32, %c0_i32_0 : i32, i32
  }
  func.func @transform_9(%arg0: i32) -> (i32, i32) {
    %c0_i32 = arith.constant 0 : i32
    %c0_i32_0 = arith.constant 0 : i32
    %c0_i32_1 = arith.constant 0 : i32
    return %c0_i32, %c0_i32_0 : i32, i32
  }
  func.func @transform_10(%arg0: i32) -> (i32, i32) {
    %c0_i32 = arith.constant 0 : i32
    %c0_i32_0 = arith.constant 0 : i32
    %c0_i32_1 = arith.constant 0 : i32
    return %c0_i32, %c0_i32_0 : i32, i32
  }
  func.func @transform_11(%arg0: i32) -> (i32, i32) {
    %c0_i32 = arith.constant 0 : i32
    %c0_i32_0 = arith.constant 0 : i32
    %c0_i32_1 = arith.constant 0 : i32
    return %c0_i32, %c0_i32_0 : i32, i32
  }
  func.func @transform_12(%arg0: i32) -> (i32, i32) {
    %c0_i32 = arith.constant 0 : i32
    %c0_i32_0 = arith.constant 0 : i32
    return %arg0, %c0_i32 : i32, i32
  }
}

</mosaic_0001>

<bundles_post_ra>
// kernel: koopman_encoder_forward.1
= control target key start
LH: loop header
LB: loop body
LE: loop exit
PB: predicated region body
PF: predicated region fallthrough
CT: control target
= control target key end

     0   :  { %v674_v0 = vmov 0.0   ;;  %vm675_vm0 = vmmov 0   ;;  %vm59_vm1 = vcmask 130048   ;;  %vm226_vm2 = vcmask 1043456   ;;  %s677_s14 = smov 48   ;;  %s868_s2 = inlined_call_operand.vmem [shape: bf16[16,128], index: 2, kind: input, shape index: {}]   ;;  %s869_s0 = inlined_call_operand.vmem [shape: bf16[8,16], index: 0, kind: input, shape index: {}]   ;;  %s870_s4 = inlined_call_operand.vmem [shape: bf16[128,32], index: 4, kind: input, shape index: {}]   ;;  %s871_s7 = inlined_call_operand.vmem [shape: bf16[8,32], index: 7, kind: input, shape index: {}]   ;;  %s872_s6 = inlined_call_operand.vmem [shape: bf16[32,32], index: 6, kind: input, shape index: {}]   ;;  %s873_s1 = inlined_call_operand.vmem [shape: bf16[8,8], index: 1, kind: input, shape index: {}]   ;;  %s874_s3 = inlined_call_operand.vmem [shape: f32[1,128], index: 3, kind: input, shape index: {}]   ;;  %s875_s8 = inlined_call_operand.vmem [shape: bf16[32,128], index: 8, kind: input, shape index: {}]   ;;  %s876_s5 = inlined_call_operand.vmem [shape: f32[1,32], index: 5, kind: input, shape index: {}]   ;;  %s877_s10 = inlined_call_operand.vmem [shape: bf16[128,16], index: 10, kind: input, shape index: {}]   ;;  %s878_s9 = inlined_call_operand.vmem [shape: f32[1,128], index: 9, kind: input, shape index: {}]   ;;  %s879_s11 = inlined_call_operand.vmem [shape: f32[1,16], index: 11, kind: input, shape index: {}]   ;;  %s880_s12 = inlined_call_operand.vmem [shape: bf16[8,80], index: 12, kind: output, shape index: {}]  }
   0x1   :  { %581 = vmatprep.subr.bf16.mxu1 %v674_v0  ;;  %v653_v1 = vld [vmem:[%s868_s2] sm:$0xff]   ;;  %583 = vmatprep.mubr.msk.bf16.mxu1 %vm675_vm0, %v674_v0  ;;  %v654_v3 = vld [vmem:[%s870_s4 + $0x38] sm:$0xff]   ;;  %v655_v4 = vld [vmem:[%s870_s4 + $0x30] sm:$0xff]   ;;  %vm222_vm3 = vcmask 64512   ;;  %vm282_vm4 = vcmask 261120   ;;  %vm515_vm5 = vcmask 392192  }
   0x2   :  { %v42_v2 = vld [vmem:[%s869_s0] sm:$0xf]  ;;  %607 = vmatprep.subr.bf16.mxu0 %v674_v0  ;;  %609 = vmatprep.mubr.msk.bf16.mxu0 %vm675_vm0, %v674_v0  ;;  %v656_v5 = vld [vmem:[%s870_s4 + $0x28] sm:$0xff]   ;;  %v658_v7 = vld [vmem:[%s870_s4 + $0x18] sm:$0xff]   ;;  %vm518_vm6 = vcmask 650240  }
   0x3   :  { %582 = vmatpush3.bf16.msra.mxu1 %v653_v1  ;;  %v657_v6 = vld [vmem:[%s870_s4 + $0x20] sm:$0xff]   ;;  %v659_v8 = vld [vmem:[%s870_s4 + $0x10] sm:$0xff]   ;;  %v660_v9 = vld [vmem:[%s870_s4 + $0x8] sm:$0xff]  }
   0x4   :  { %587 = vmatprep.subr.bf16.mxu1 %v674_v0  ;;  %v661_v10 = vld [vmem:[%s870_s4] sm:$0xff]   ;;  %v662_v20 = vld [vmem:[%s872_s6 + $0x8] sm:$0xff]   ;;  %v666_v40 = vld [vmem:[%s877_s10 + $0x38] sm:$0xff]  }
   0x5   :  { %v221_v11 = vld [vmem:[%s871_s7] sm:$0xf]  ;;  %v664_v25 = vld [vmem:[%s875_s8 + $0x8] sm:$0xff]   ;;  %v667_v44 = vld [vmem:[%s877_s10 + $0x30] sm:$0xff]  }
   0x6   :  { %584 = vmatmul.mubr.msk.bf16.vlgmr.msra.gmra.mxu1 %vm59_vm1, %v42_v2  ;;  %v228_v12 = vsel %vm226_vm2, %v221_v11, 0  ;;  %v43_v13 = vld [vmem:[%s873_s1] sm:$0xf]  ;;  %v668_v45 = vld [vmem:[%s877_s10 + $0x28] sm:$0xff]   ;;  %v670_v47 = vld [vmem:[%s877_s10 + $0x18] sm:$0xff]  }
   0x7   :  { %588 = vmatpush3.bf16.msra.mxu1 %v654_v3  ;;  %603 = vmatprep.mubr.msk.bf16.mxu1 %vm675_vm0, %v674_v0  ;;  %v524_v14 = vld [vmem:[%s874_s3] ss:$0 sm:$0xff]  ;;  %v671_v48 = vld [vmem:[%s877_s10 + $0x10] sm:$0xff]   ;;  %v672_v49 = vld [vmem:[%s877_s10 + $0x8] sm:$0xff]  }
   0x8   :  { %589 = vmatprep.subr.bf16.mxu1 %v674_v0  ;;  %608 = vmatpush3.bf16.msra.mxu0 %v228_v12  ;;  %v663_v23 = vld [vmem:[%s872_s6] sm:$0xff]   ;;  %s676_s6 = smov 16  }
   0x9   :  { %621 = vmatprep.subr.bf16.mxu0 %v674_v0  ;;  %v527_v29 = vld [vmem:[%s876_s5] ss:$0 sm:$0xff] }
   0xa   :  { %v665_v36 = vld [vmem:[%s875_s8] sm:$0xff]  }
   0xb   :  { %590 = vmatpush3.bf16.msra.mxu1 %v655_v4  ;;  %610 = vmatmul.mubr.msk.bf16.vlgmr.msra.gmra.mxu0 %vm222_vm3, %v43_v13  ;;  %v669_v46 = vld [vmem:[%s877_s10 + $0x20] sm:$0xff]  }
   0xc   :  { %591 = vmatprep.subr.bf16.mxu1 %v674_v0  ;;  %625 = vmatprep.mubr.msk.bf16.mxu0 %vm675_vm0, %v674_v0  ;;  %v673_v50 = vld [vmem:[%s877_s10] sm:$0xff]  }
   0xd   :  { %622 = vmatpush3.bf16.msra.mxu0 %v664_v25  ;;  %v540_v51 = vld [vmem:[%s878_s9] ss:$0 sm:$0xff] }
   0xe   :  { %623 = vmatprep.subr.bf16.mxu0 %v674_v0  ;;  %v544_v59 = vld [vmem:[%s879_s11] ss:$0 sm:$0xff] }
   0xf   :  { %592 = vmatpush3.bf16.msra.mxu1 %v656_v5 }
  0x10   :  { %593 = vmatprep.subr.bf16.mxu1 %v674_v0 }
  0x11   :  { %624 = vmatpush3.bf16.msra.mxu0 %v665_v36 }
  0x12   :  { %629 = vmatprep.subr.bf16.mxu0 %v674_v0 }
  0x13   :  { %594 = vmatpush3.bf16.msra.mxu1 %v657_v6 }
  0x14   :  { %595 = vmatprep.subr.bf16.mxu1 %v674_v0 }
  0x17   :  { %596 = vmatpush3.bf16.msra.mxu1 %v658_v7 }
  0x18   :  { %597 = vmatprep.subr.bf16.mxu1 %v674_v0 }
  0x1b   :  { %598 = vmatpush3.bf16.msra.mxu1 %v659_v8 }
  0x1c   :  { %599 = vmatprep.subr.bf16.mxu1 %v674_v0 }
  0x1f   :  { %600 = vmatpush3.bf16.msra.mxu1 %v660_v9 }
  0x20   :  { %601 = vmatprep.subr.bf16.mxu1 %v674_v0 }
  0x23   :  { %602 = vmatpush3.bf16.msra.mxu1 %v661_v10 }
  0x24   :  { %613 = vmatprep.subr.bf16.mxu1 %v674_v0 }
  0xc6   :  { %v97_v15 = vpop.f32.mrf.mxu1 }
  0xc7   :  { %v98_v16 = vadd.f32 %v524_v14, %v97_v15 }
  0xc8   :  { %v585_v17 = vpop.f32.mrf.mxu1 }
  0xc9   :  { %v103_v18 = vmax.f32 %v98_v16, 0.0 }
  0xca   :  { %v100_v19 = vpop.f32.mrf.mxu1 }
  0xcb   :  { %v104_v21 = vpack.c.bf16 %v103_v18, %v103_v18  ;;  %v264_v24 = vpop.f32.mrf.mxu0 }
  0xcc   :  { %v586_v22 = vpop.f32.mrf.mxu1 }
  0xcd   :  { %604 = vmatmul.mubr.bf16.vlgmr.msra.gmra.mxu1 %v104_v21  ;;  %v611_v26 = vpop.f32.mrf.mxu0 }
  0xce   :  { %614 = vmatpush3.bf16.msra.mxu1 %v662_v20  ;;  %617 = vmatprep.mubr.msk.bf16.mxu1 %vm675_vm0, %v674_v0 }
  0xcf   :  { %615 = vmatprep.subr.bf16.mxu1 %v674_v0  ;;  %v267_v27 = vpop.f32.mrf.mxu0 }
  0xd1   :  { %v612_v28 = vpop.f32.mrf.mxu0 }
  0xd2   :  { %616 = vmatpush3.bf16.msra.mxu1 %v663_v23 }
 0x18d   :  { %v210_v30 = vpop.f32.mrf.mxu1 }
 0x18e   :  { %v211_v31 = vadd.f32 %v527_v29, %v210_v30 }
 0x18f   :  { %v605_v32 = vpop.f32.mrf.mxu1 }
 0x190   :  { %v216_v33 = vpack.c.bf16 %v211_v31, %v211_v31  ;;  %507 = vrot.lane.b32.xlu0 %v211_v31, %s676_s6 }
 0x191   :  { %v213_v34 = vpop.f32.mrf.mxu1 }
 0x192   :  { %618 = vmatmul.mubr.msk.bf16.vlgmr.msra.gmra.mxu1 %vm282_vm4, %v216_v33 }
 0x193   :  { %v606_v35 = vpop.f32.mrf.mxu1 }
 0x202   :  { %v508_v60 = vpop.permute.xlu0 %507 }
 0x252   :  { %v320_v37 = vpop.f32.mrf.mxu1 }
 0x253   :  { %v321_v38 = vadd.f32 %v320_v37, %v264_v24 }
 0x254   :  { %v619_v39 = vpop.f32.mrf.mxu1 }
 0x255   :  { %v326_v41 = vpack.c.bf16 %v321_v38, %v321_v38  ;;  %511 = vrot.lane.b32.xlu0 %v321_v38, %s677_s14 }
 0x256   :  { %v323_v42 = vpop.f32.mrf.mxu1 }
 0x257   :  { %626 = vmatmul.mubr.msk.bf16.vlgmr.msra.gmra.mxu0 %vm282_vm4, %v326_v41 }
 0x258   :  { %v620_v43 = vpop.f32.mrf.mxu1  ;;  %630 = vmatpush3.bf16.msra.mxu0 %v666_v40  ;;  %645 = vmatprep.mubr.msk.bf16.mxu0 %vm675_vm0, %v674_v0 }
 0x259   :  { %631 = vmatprep.subr.bf16.mxu0 %v674_v0 }
 0x25c   :  { %632 = vmatpush3.bf16.msra.mxu0 %v667_v44 }
 0x25d   :  { %633 = vmatprep.subr.bf16.mxu0 %v674_v0 }
 0x260   :  { %634 = vmatpush3.bf16.msra.mxu0 %v668_v45 }
 0x261   :  { %635 = vmatprep.subr.bf16.mxu0 %v674_v0 }
 0x264   :  { %636 = vmatpush3.bf16.msra.mxu0 %v669_v46 }
 0x265   :  { %637 = vmatprep.subr.bf16.mxu0 %v674_v0 }
 0x268   :  { %638 = vmatpush3.bf16.msra.mxu0 %v670_v47 }
 0x269   :  { %639 = vmatprep.subr.bf16.mxu0 %v674_v0 }
 0x26c   :  { %640 = vmatpush3.bf16.msra.mxu0 %v671_v48 }
 0x26d   :  { %641 = vmatprep.subr.bf16.mxu0 %v674_v0 }
 0x270   :  { %642 = vmatpush3.bf16.msra.mxu0 %v672_v49 }
 0x271   :  { %643 = vmatprep.subr.bf16.mxu0 %v674_v0 }
 0x274   :  { %644 = vmatpush3.bf16.msra.mxu0 %v673_v50 }
 0x2c7   :  { %v512_v0 = vpop.permute.xlu0 %511 }
 0x317   :  { %v387_v52 = vpop.f32.mrf.mxu0 }
 0x318   :  { %v388_v53 = vadd.f32 %v540_v51, %v387_v52 }
 0x319   :  { %v627_v54 = vpop.f32.mrf.mxu0 }
 0x31a   :  { %v393_v55 = vmax.f32 %v388_v53, 0.0 }
 0x31b   :  { %v390_v56 = vpop.f32.mrf.mxu0 }
 0x31c   :  { %v394_v57 = vpack.c.bf16 %v393_v55, %v393_v55 }
 0x31d   :  { %v628_v58 = vpop.f32.mrf.mxu0 }
 0x31e   :  { %646 = vmatmul.mubr.bf16.vlgmr.msra.gmra.mxu0 %v394_v57 }
 0x3de   :  { %v500_v61 = vpop.f32.mrf.mxu0 }
 0x3df   :  { %v501_v62 = vadd.f32 %v544_v59, %v500_v61 }
 0x3e0   :  { %v647_v63 = vpop.f32.mrf.mxu0 }
 0x3e1   :  { %v514_v1 = vsel %vm59_vm1, %v501_v62, %v508_v60 }
 0x3e2   :  { %v516_v2 = vsel %vm515_vm5, %v514_v1, %v512_v0  ;;  %v503_v3 = vpop.f32.mrf.mxu0 }
 0x3e3   :  { %v517_v4 = vpack.c.bf16 %v516_v2, %v516_v2 }
 0x3e4   :  { %v648_v5 = vpop.f32.mrf.mxu0 }
 0x3e5   :  { %519 = vst.msk [vmem:[%s880_s12] sm:$0xf] %vm518_vm6, %v517_v4 }

</bundles_post_ra>
